<compile_context>
chip_gen: v7x
topology: tpu7x:2x2x1
jax: 0.10.0
libtpu: 0.0.40
codegen_flags: <defaults>
</compile_context>

<pallas_src>
import jax
import jax.numpy as jnp
from jax.experimental import pallas as pl
from jax.experimental.pallas import tpu as pltpu


def _round_up(x, m):
    return ((x + m - 1) // m) * m


def standout_kernel(seed_ref, x_ref, w_ref, b_ref, o_ref):
    tm, dp = o_ref.shape

    x = x_ref[...]                                    # (TM, Din) bf16

    # One fused MXU matmul for both linear layers -> (TM, 2*Dout_pad), f32 acc.
    y = jnp.dot(x, w_ref[...], preferred_element_type=jnp.float32) + b_ref[...]
    x_out = y[:, :dp]                                 # fc output
    probs = jax.nn.sigmoid(y[:, dp:])                 # keep probability (EUP)

    # ---- Bernoulli(probs) via counter-based hash PRNG ----------------------
    # Counter = global element index -> mask independent of tiling.
    # (int32 counter wraps for > 2^31 mask elements; fine for dropout.)
    row = jax.lax.broadcasted_iota(jnp.int32, (tm, dp), 0) + pl.program_id(0) * tm
    col = jax.lax.broadcasted_iota(jnp.int32, (tm, dp), 1)
    h = row * dp + col
    h = h ^ (seed_ref[0] * (0x9E3779B1 - (1 << 32)))          # golden-ratio seed mix
    h = h ^ ((h >> 16) & 0xFFFF)                               # logical >> 16
    h = h * (0x85EBCA6B - (1 << 32))
    h = h ^ ((h >> 13) & 0x7FFFF)                              # logical >> 13
    h = h * (0xC2B2AE35 - (1 << 32))
    h = h ^ ((h >> 16) & 0xFFFF)
    u_bits = (h >> 9) & 0x7FFFFF                               # high 23 bits, logical
    thresh = (probs * 8388608.0).astype(jnp.int32)             # probs * 2^23
    keep = u_bits < thresh

    o_ref[...] = jnp.where(keep, x_out, 0.0).astype(o_ref.dtype)


def prepare_standout_params(w_fc, b_fc, w_prob, b_prob, dtype=jnp.bfloat16):
    """One-time prep (outside the hot path): transpose, fuse, pad, cast.

    w_*: (Dout, Din) PyTorch nn.Linear layout; b_*: (Dout,).
    Returns (w_fused, b_fused, dout) with
      w_fused: (Din, 2*Dout_pad) bf16 = [W_fc.T | W_prob.T], zero padded cols
      b_fused: (1, 2*Dout_pad)   f32  = [b_fc   | b_prob  ], zero padded
    """
    w_fc = jnp.asarray(w_fc, jnp.float32)
    w_prob = jnp.asarray(w_prob, jnp.float32)
    b_fc = jnp.asarray(b_fc, jnp.float32)
    b_prob = jnp.asarray(b_prob, jnp.float32)

    dout, din = w_fc.shape
    dp = _round_up(dout, 128)

    w = jnp.zeros((din, 2 * dp), dtype)
    w = w.at[:, :dout].set(w_fc.T.astype(dtype))
    w = w.at[:, dp:dp + dout].set(w_prob.T.astype(dtype))
    b = jnp.zeros((1, 2 * dp), jnp.float32)          # bias added to f32 accumulator
    b = b.at[0, :dout].set(b_fc)
    b = b.at[0, dp:dp + dout].set(b_prob)
    return w, b, dout


def standout_apply(x, w_fused, b_fused, dout, seed, *, training=True,
                   vmem_budget_bytes=32 << 20, max_block_rows=2048):
    """x: (..., Din); w_fused/b_fused from prepare_standout_params."""
    x = jnp.asarray(x)
    orig_shape = x.shape
    if x.ndim != 2:
        x = x.reshape(-1, orig_shape[-1])
    b_rows, din = x.shape
    _, two_dp = w_fused.shape
    dp = two_dp // 2

    xc = x.astype(w_fused.dtype)                     # bf16 activations (halves HBM traffic)

    if not training:
        y = jnp.dot(xc, w_fused[:, :dp], preferred_element_type=jnp.float32)
        y = y + b_fused[:, :dp]
        return y[:, :dout].reshape(orig_shape[:-1] + (dout,))

    # ---- VMEM budgeting: derive batch tile from an explicit budget ---------
    # BlockSpec double-buffers every operand; weights are resident (constant
    # index_map), x/out tiles stream.
    itemsize_x = xc.dtype.itemsize
    w_bytes = 2 * (w_fused.size * w_fused.dtype.itemsize
                   + b_fused.size * b_fused.dtype.itemsize)
    per_row = 2 * (din * itemsize_x) + 2 * (dp * 4)
    avail = max(vmem_budget_bytes - w_bytes - (1 << 20), per_row * 8)
    tm = max(8, min(max_block_rows, avail // per_row, _round_up(b_rows, 8)))
    tm = (tm // 8) * 8
    if tm >= b_rows:
        tm = b_rows                                  # single full-dim tile (any size is legal)
    grid = (pl.cdiv(b_rows, tm),)                    # ragged tail handled by masked final tile

    vmem_need = w_bytes + per_row * tm + (1 << 20)
    vmem_limit = int(max(vmem_budget_bytes, vmem_need))

    seed_arr = jnp.asarray([seed], dtype=jnp.int32)

    cost = pl.CostEstimate(
        flops=int(2 * b_rows * din * two_dp),
        transcendentals=int(b_rows * dp),            # sigmoid
        bytes_accessed=int(b_rows * din * itemsize_x
                           + din * two_dp * w_fused.dtype.itemsize
                           + two_dp * 4
                           + b_rows * dp * 4),
    )

    out = pl.pallas_call(
        standout_kernel,
        out_shape=jax.ShapeDtypeStruct((b_rows, dp), jnp.float32),
        grid_spec=pltpu.PrefetchScalarGridSpec(
            num_scalar_prefetch=1,                   # seed -> SMEM
            grid=grid,
            in_specs=[
                pl.BlockSpec((tm, din), lambda i, seed_ref: (i, 0)),       # x streams
                pl.BlockSpec((din, two_dp), lambda i, seed_ref: (0, 0)),   # weights resident
                pl.BlockSpec((1, two_dp), lambda i, seed_ref: (0, 0)),     # bias resident
            ],
            out_specs=pl.BlockSpec((tm, dp), lambda i, seed_ref: (i, 0)),
        ),
        compiler_params=pltpu.CompilerParams(
            # TODO(synk): on v7x consider pltpu.CORE_PARALLEL / pl.core_map to
            # guarantee the 2-TC split of the batch axis.
            dimension_semantics=("parallel",),
            vmem_limit_bytes=vmem_limit,
        ),
        cost_estimate=cost,
    )(seed_arr, xc, w_fused, b_fused)

    return out[:, :dout].reshape(orig_shape[:-1] + (dout,))


if __name__ == "__main__":
    key = jax.random.PRNGKey(0)
    k_x, k_wf, k_bf, k_wp, k_bp = jax.random.split(key, 5)

    B, Din, Dout = 8, 32, 32

    x = jax.random.normal(k_x, (B, Din), dtype=jnp.float32)
    lim = 1.0 / (Din ** 0.5)
    w_fc = jax.random.uniform(k_wf, (Dout, Din), jnp.float32, -lim, lim)
    b_fc = jax.random.uniform(k_bf, (Dout,), jnp.float32, -lim, lim)
    w_prob = jax.random.uniform(k_wp, (Dout, Din), jnp.float32, -lim, lim)
    b_prob = jax.random.uniform(k_bp, (Dout,), jnp.float32, -lim, lim)

    # One-time parameter prep (transpose / fuse / pad / bf16 cast).
    w_fused, b_fused, dout = prepare_standout_params(w_fc, b_fc, w_prob, b_prob)

    out = standout_apply(x, w_fused, b_fused, dout, seed=1234, training=True)
    out = jax.block_until_ready(out)
    assert out.shape == (B, Dout)

    # Sanity: every output is either 0 (dropped) or ~= the dense fc output
    # (kept).  Tolerance loosened for the bf16 inputs/weights (f32 accumulate).
    dense = x @ w_fc.T + b_fc
    kept_ok = jnp.isclose(out, dense, rtol=5e-2, atol=5e-2)
    dropped = (out == 0.0)
    assert bool(jnp.all(kept_ok | dropped))
    frac_zero = float(jnp.mean(dropped.astype(jnp.float32)))
    assert 0.02 < frac_zero < 0.98  # mask is actually doing something sensible

    # Eval path matches the plain linear layer (bf16 tolerance).
    out_eval = standout_apply(x, w_fused, b_fused, dout, seed=0, training=False)
    out_eval = jax.block_until_ready(out_eval)
    assert bool(jnp.allclose(out_eval, dense, rtol=5e-2, atol=5e-2))

    print("KERNEL_OK")
</pallas_src>

<mosaic_0001>
module attributes {stable_mosaic.version = 11 : i64} {
  func.func @standout_kernel(%arg0: i32, %arg1: memref<1xi32, #tpu.memory_space<smem>>, %arg2: memref<8x32xbf16, #tpu.memory_space<vmem>>, %arg3: memref<32x256xbf16, #tpu.memory_space<vmem>>, %arg4: memref<1x256xf32, #tpu.memory_space<vmem>>, %arg5: memref<8x128xf32, #tpu.memory_space<vmem>>) attributes {dimension_semantics = [#tpu.dimension_semantics<parallel>], iteration_bounds = array<i64: 1>, scalar_prefetch = 1 : i64, scratch_operands = 0 : i64, tpu.core_type = #tpu.core_type<tc>, window_params = [{transform_indices = @transform_0, window_bounds = array<i64: 8, 32>}, {pipeline_mode = #tpu.pipeline_mode<synchronous>, transform_indices = @transform_1, window_bounds = array<i64: 32, 256>}, {pipeline_mode = #tpu.pipeline_mode<synchronous>, transform_indices = @transform_2, window_bounds = array<i64: 1, 256>}, {transform_indices = @transform_3, window_bounds = array<i64: 8, 128>}]} {
    %c0 = arith.constant 0 : index
    %c0_0 = arith.constant 0 : index
    %0 = vector.load %arg2[%c0, %c0_0] : memref<8x32xbf16, #tpu.memory_space<vmem>>, vector<8x32xbf16>
    %c0_1 = arith.constant 0 : index
    %c0_2 = arith.constant 0 : index
    %1 = vector.load %arg3[%c0_1, %c0_2] : memref<32x256xbf16, #tpu.memory_space<vmem>>, vector<32x256xbf16>
    %cst = arith.constant dense<0.000000e+00> : vector<8x256xf32>
    %2 = tpu.matmul %0, %1, %cst {dimension_numbers = #tpu.dot_dimension_numbers<[1], [0], [0], [1], [0, 0, 1, 1], [], []>} : vector<8x32xbf16>, vector<32x256xbf16>, vector<8x256xf32> -> vector<8x256xf32>
    %c0_3 = arith.constant 0 : index
    %c0_4 = arith.constant 0 : index
    %3 = vector.load %arg4[%c0_3, %c0_4] : memref<1x256xf32, #tpu.memory_space<vmem>>, vector<1x256xf32>
    %4 = vector.broadcast %3 : vector<1x256xf32> to vector<8x256xf32>
    %5 = arith.addf %2, %4 : vector<8x256xf32>
    %6 = vector.extract_strided_slice %5 {offsets = [0, 0], sizes = [8, 128], strides = [1, 1]} : vector<8x256xf32> to vector<8x128xf32>
    %7 = vector.extract_strided_slice %5 {offsets = [0, 128], sizes = [8, 128], strides = [1, 1]} : vector<8x256xf32> to vector<8x128xf32>
    %8 = arith.negf %7 : vector<8x128xf32>
    %9 = math.exp %8 : vector<8x128xf32>
    %cst_5 = arith.constant 1.000000e+00 : f32
    %10 = vector.broadcast %cst_5 : f32 to vector<8x128xf32>
    %11 = arith.addf %10, %9 : vector<8x128xf32>
    %12 = arith.divf %10, %11 : vector<8x128xf32>
    %13 = tpu.iota {dimensions = array<i32: 0>} : vector<8x128xi32>
    %c8_i32 = arith.constant 8 : i32
    %14 = arith.muli %arg0, %c8_i32 : i32
    %15 = vector.broadcast %14 : i32 to vector<8x128xi32>
    %16 = arith.addi %13, %15 : vector<8x128xi32>
    %17 = tpu.iota {dimensions = array<i32: 1>} : vector<8x128xi32>
    %c128_i32 = arith.constant 128 : i32
    %18 = vector.broadcast %c128_i32 : i32 to vector<8x128xi32>
    %19 = arith.muli %16, %18 : vector<8x128xi32>
    %20 = arith.addi %19, %17 : vector<8x128xi32>
    %c0_6 = arith.constant 0 : index
    %21 = memref.load %arg1[%c0_6] : memref<1xi32, #tpu.memory_space<smem>>
    %c-1640531535_i32 = arith.constant -1640531535 : i32
    %22 = arith.muli %21, %c-1640531535_i32 : i32
    %23 = vector.broadcast %22 : i32 to vector<8x128xi32>
    %24 = arith.xori %20, %23 : vector<8x128xi32>
    %c16_i32 = arith.constant 16 : i32
    %25 = vector.broadcast %c16_i32 : i32 to vector<8x128xi32>
    %26 = arith.shrsi %24, %25 : vector<8x128xi32>
    %c65535_i32 = arith.constant 65535 : i32
    %27 = vector.broadcast %c65535_i32 : i32 to vector<8x128xi32>
    %28 = arith.andi %26, %27 : vector<8x128xi32>
    %29 = arith.xori %24, %28 : vector<8x128xi32>
    %c-2048144789_i32 = arith.constant -2048144789 : i32
    %30 = vector.broadcast %c-2048144789_i32 : i32 to vector<8x128xi32>
    %31 = arith.muli %29, %30 : vector<8x128xi32>
    %c13_i32 = arith.constant 13 : i32
    %32 = vector.broadcast %c13_i32 : i32 to vector<8x128xi32>
    %33 = arith.shrsi %31, %32 : vector<8x128xi32>
    %c524287_i32 = arith.constant 524287 : i32
    %34 = vector.broadcast %c524287_i32 : i32 to vector<8x128xi32>
    %35 = arith.andi %33, %34 : vector<8x128xi32>
    %36 = arith.xori %31, %35 : vector<8x128xi32>
    %c-1028477387_i32 = arith.constant -1028477387 : i32
    %37 = vector.broadcast %c-1028477387_i32 : i32 to vector<8x128xi32>
    %38 = arith.muli %36, %37 : vector<8x128xi32>
    %c16_i32_7 = arith.constant 16 : i32
    %39 = vector.broadcast %c16_i32_7 : i32 to vector<8x128xi32>
    %40 = arith.shrsi %38, %39 : vector<8x128xi32>
    %c65535_i32_8 = arith.constant 65535 : i32
    %41 = vector.broadcast %c65535_i32_8 : i32 to vector<8x128xi32>
    %42 = arith.andi %40, %41 : vector<8x128xi32>
    %43 = arith.xori %38, %42 : vector<8x128xi32>
    %c9_i32 = arith.constant 9 : i32
    %44 = vector.broadcast %c9_i32 : i32 to vector<8x128xi32>
    %45 = arith.shrsi %43, %44 : vector<8x128xi32>
    %c8388607_i32 = arith.constant 8388607 : i32
    %46 = vector.broadcast %c8388607_i32 : i32 to vector<8x128xi32>
    %47 = arith.andi %45, %46 : vector<8x128xi32>
    %cst_9 = arith.constant 0x4B000000 : f32
    %48 = vector.broadcast %cst_9 : f32 to vector<8x128xf32>
    %49 = arith.mulf %12, %48 : vector<8x128xf32>
    %50 = arith.fptosi %49 : vector<8x128xf32> to vector<8x128xi32>
    %51 = arith.cmpi slt, %47, %50 : vector<8x128xi32>
    %cst_10 = arith.constant 0.000000e+00 : f32
    %52 = vector.broadcast %cst_10 : f32 to vector<8x128xf32>
    %53 = arith.select %51, %6, %52 : vector<8x128xi1>, vector<8x128xf32>
    %c0_11 = arith.constant 0 : index
    %c0_12 = arith.constant 0 : index
    %54 = vector.load %arg5[%c0_11, %c0_12] : memref<8x128xf32, #tpu.memory_space<vmem>>, vector<8x128xf32>
    tpu.vector_store %arg5[%c0_11, %c0_12], %53 {strides = array<i32>} : memref<8x128xf32, #tpu.memory_space<vmem>>, vector<8x128xf32>,
    return
  }
  func.func @transform_0(%arg0: i32, %arg1: memref<1xi32, #tpu.memory_space<smem>>) -> (i32, i32) {
    %c0_i32 = arith.constant 0 : i32
    %c0_i32_0 = arith.constant 0 : i32
    return %arg0, %c0_i32 : i32, i32
  }
  func.func @transform_1(%arg0: i32, %arg1: memref<1xi32, #tpu.memory_space<smem>>) -> (i32, i32) {
    %c0_i32 = arith.constant 0 : i32
    %c0_i32_0 = arith.constant 0 : i32
    %c0_i32_1 = arith.constant 0 : i32
    return %c0_i32, %c0_i32_0 : i32, i32
  }
  func.func @transform_2(%arg0: i32, %arg1: memref<1xi32, #tpu.memory_space<smem>>) -> (i32, i32) {
    %c0_i32 = arith.constant 0 : i32
    %c0_i32_0 = arith.constant 0 : i32
    %c0_i32_1 = arith.constant 0 : i32
    return %c0_i32, %c0_i32_0 : i32, i32
  }
  func.func @transform_3(%arg0: i32, %arg1: memref<1xi32, #tpu.memory_space<smem>>) -> (i32, i32) {
    %c0_i32 = arith.constant 0 : i32
    %c0_i32_0 = arith.constant 0 : i32
    return %arg0, %c0_i32 : i32, i32
  }
}

</mosaic_0001>

<bundles_post_ra>
// kernel: tpu_custom_call.1
= control target key start
LH: loop header
LB: loop body
LE: loop exit
PB: predicated region body
PF: predicated region fallthrough
CT: control target
= control target key end

     0   :  { %10 = vsyncpa [#allocation5], 0  ;;  %s359_s0 = inlined_call_operand.<no memory space> [shape: s32[1], index: 0, kind: input, shape index: {}]   ;;  %s360_s1 = inlined_call_operand.hbm [shape: bf16[8,32], index: 1, kind: input, shape index: {}]   ;;  %s361_s2 = inlined_call_operand.hbm [shape: bf16[32,256], index: 2, kind: input, shape index: {}]   ;;  %s362_s3 = inlined_call_operand.vmem [shape: f32[1,256], index: 3, kind: input, shape index: {}]   ;;  %s363_s4 = inlined_call_operand.hbm [shape: f32[8,128], index: 4, kind: output, shape index: {}]  }
   0x1   :  { %11 = vsyncpa [#allocation8], 0 }
   0x2   :  { %12 = vsyncpa [#allocation6], 0  ;;  %s279_s15 = smov [#allocation4]   ;;  %s280_s17 = smov [#allocation7]  }
   0x3   :  { %s19_s16 = sshll.u32 %s279_s15, 4  ;;  %s28_s18 = sshll.u32 %s280_s17, 4  ;;  %s20_s16 = int_to_ptr.vmem [resolvable:$true] %s19_s16  ;;  %s310_s18 = int_to_ptr.vmem [resolvable:$true] %s28_s18 }
   0x4   :  { %s207_s21 = scalar_lea.hbm %s360_s1, 64 }
   0x5   :  { %p208_p0 = scmp.ne.s32.totalorder %s360_s1, %s207_s21  ;;  %p211_p1 = scmp.lt.u32.totalorder %s207_s21, %s360_s1 }
   0x7   :  { %p213_p2 = pnand %p211_p1, %p208_p0 }
   0x9   :  { %216 = shalt.err (!%p213_p2)
}
   0xa   :  { %s217_s26 = scalar_lea.vmem %s20_s16, 64  ;;  %p222_p4 = scmp.lt.s32.totalorder %s20_s16, %s20_s16 }
   0xb   :  { %p218_p3 = scmp.ne.s32.totalorder %s20_s16, %s217_s26  ;;  %p223_p5 = scmp.lt.s32.totalorder %s217_s26, %s217_s26 }
   0xd   :  { %p224_p6 = por %p223_p5, %p222_p4 }
   0xf   :  { %p225_p7 = pnand %p224_p6, %p218_p3 }
  0x11   :  { %228 = shalt.err (!%p225_p7)
}
  0x12   :  { %22 = dma.hbm_to_vmem [thread:$0]  %s360_s1, 64, %s20_s16, [#allocation5]  }
  0x13   :  { %s229_s5 = scalar_lea.hbm %s361_s2, 512 }
  0x14   :  { %p230_p8 = scmp.ne.s32.totalorder %s361_s2, %s229_s5  ;;  %p233_p9 = scmp.lt.u32.totalorder %s229_s5, %s361_s2 }
  0x16   :  { %p235_p10 = pnand %p233_p9, %p230_p8 }
  0x18   :  { %238 = shalt.err (!%p235_p10)
}
  0x19   :  { %s239_s10 = scalar_lea.vmem %s310_s18, 512  ;;  %p244_p12 = scmp.lt.s32.totalorder %s310_s18, %s310_s18 }
  0x1a   :  { %p240_p11 = scmp.ne.s32.totalorder %s310_s18, %s239_s10  ;;  %p245_p13 = scmp.lt.s32.totalorder %s239_s10, %s239_s10 }
  0x1c   :  { %p246_p0 = por %p245_p13, %p244_p12 }
  0x1e   :  { %p247_p1 = pnand %p246_p0, %p240_p11 }
  0x20   :  { %250 = shalt.err (!%p247_p1)
}
  0x21   :  { %s281_s1 = smov 128   ;;  %s282_s11 = smov 8  }
  0x22   :  { %34 = dma.hbm_to_vmem [thread:$0]  %s361_s2, 512, %s310_s18, [#allocation8], %s281_s1, %s281_s1, %s282_s11  }
  0x23   :  { %273 = dma.done.wait [#allocation5], 64  }
  0x24   :  { %274 = vsyncadd [#allocation5], 4294967232 }
  0x25   :  { %275 = dma.done.wait [#allocation8], 512  }
  0x26   :  { %276 = vsyncadd [#allocation8], 4294966784  ;;  %v283_v0 = vmov 0   ;;  %v197_v1 = vld [vmem:[#allocation7 + $0x4] ss:$8 sps:$4 sm:$0xff]   ;;  %vm81_vm0 = vcmask 261120   ;;  %v51_v6 = vlaneseq }
  0x27   :  { %117 = vmatprep.mubr.bf16.mxu0 %v283_v0  ;;  %v199_v2 = vld [vmem:[#allocation7] ss:$8 sps:$4 sm:$0xff]   ;;  %85 = vmatprep.subr.bf16.mxu0 %v197_v1  ;;  %v200_v3 = vld [vmem:[#allocation7 + $0x14] ss:$8 sps:$4 sm:$0xff]   ;;  %v202_v4 = vld [vmem:[#allocation7 + $0x10] ss:$8 sps:$4 sm:$0xff]  }
  0x28   :  { %86 = vmatpush1.bf16.msra.mxu0 %v199_v2  ;;  %v44_v5 = vld [vmem:[#allocation4] sm:$0xf]  ;;  %v52_v7 = vshrl.u32 %v51_v6, 7  ;;  %v138_v8 = vand.u32 127, %v51_v6  ;;  %s142_s15 = smul.u32 2654435761, %s359_s0 }
  0x29   :  { %87 = vmatprep.subr.bf16.mxu0 %v200_v3  ;;  %v49_v13 = vld [vmem:[%s362_s3] sm:$0x3]  ;;  %s284_s0 = smov [#allocation9]  }
  0x2a   :  { %v139_v9 = vmul.u32 128, %v52_v7  ;;  %v143_v11 = vstv %s142_s15  ;;  %v57_v12 = vsub.s32 1, %v52_v7  ;;  %v53_v31 = vsub.s32 0, %v52_v7  ;;  %s169_s3 = sshll.u32 %s284_s0, 4  ;;  %s170_s3 = int_to_ptr.vmem [resolvable:$true] %s169_s3 }
  0x2b   :  { %s251_s18 = scalar_lea.vmem %s170_s3, 128  ;;  %p256_p3 = scmp.lt.s32.totalorder %s170_s3, %s170_s3 }
  0x2c   :  { %88 = vmatpush1.bf16.msra.mxu0 %v202_v4  ;;  %v140_v10 = vadd.s32 %v139_v9, %v138_v8  ;;  %v58_v15 = vrot.slane %v49_v13, %v57_v12  ;;  %v54_v35 = vrot.slane %v49_v13, %v53_v31  ;;  %p252_p2 = scmp.ne.s32.totalorder %s170_s3, %s251_s18  ;;  %p257_p4 = scmp.lt.s32.totalorder %s251_s18, %s251_s18 }
  0x2e   :  { %v144_v14 = vxor.u32 %v143_v11, %v140_v10  ;;  %p258_p5 = por %p257_p4, %p256_p3 }
  0x2f   :  { %183 = vmatmul.mubr.msk.bf16.vlgmr.msra.gmra.mrb[0].mxu0 %vm81_vm0, %v44_v5 }
  0x30   :  { %v185_v17 = vshrl.u32 %v144_v14, 16  ;;  %p259_p6 = pnand %p258_p5, %p252_p2 }
  0x32   :  { %v147_v23 = vxor.u32 %v185_v17, %v144_v14 }
  0x34   :  { %v148_v24 = vmul.u32 2246822507, %v147_v23 }
  0x36   :  { %v186_v25 = vshrl.u32 %v148_v24, 13 }
  0x38   :  { %v151_v27 = vxor.u32 %v186_v25, %v148_v24 }
  0x3a   :  { %v152_v29 = vmul.u32 3266489909, %v151_v27 }
  0x3c   :  { %v187_v30 = vshrl.u32 %v152_v29, 16 }
  0x3e   :  { %v155_v32 = vxor.u32 %v187_v30, %v152_v29 }
  0x40   :  { %v188_v36 = vshrl.u32 %v155_v32, 9 }
 0x102   :  { %v119_v16 = vpop.f32.mrb[0].mxu0 }
 0x103   :  { %v121_v18 = vpop.f32.mrb[1].mxu0  ;;  %v120_v39 = vadd.f32 %v119_v16, %v54_v35 }
 0x104   :  { %v122_v19 = vadd.f32 %v121_v18, %v58_v15  ;;  %v123_v20 = vpop.f32.mrb[2].mxu0 }
 0x105   :  { %v124_v21 = vpop.f32.mrb[3].mxu0 }
 0x106   :  { %v184_v22 = vmul.f32 -1.442695, %v122_v19 }
 0x108   :  { %203 = vpow2.f32 %v184_v22 }
 0x112   :  { %v204_v26 = vpop.eup %203 }
 0x113   :  { %v129_v28 = vadd.f32 1.0, %v204_v26 }
 0x115   :  { %205 = vrcp.f32 %v129_v28 }
 0x11f   :  { %v206_v33 = vpop.eup %205 }
 0x120   :  { %v158_v34 = vmul.f32 8388608.0, %v206_v33 }
 0x122   :  { %v189_v37 = vtrunc.f32 %v158_v34 }
 0x124   :  { %v190_v38 = vcvt.f32.s32 %v189_v37 }
 0x126   :  { %vm160_vm1 = vcmp.lt.s32.totalorder %v188_v36, %v190_v38 }
 0x127   :  { %v161_v40 = vsel %vm160_vm1, %v120_v39, 0.0 }
 0x128   :  { %162 = vst [vmem:[#allocation9] sm:$0xff] %v161_v40 }
 0x129   :  { %262 = shalt.err (!%p259_p6)
}
 0x12a   :  { %s263_s21 = scalar_lea.hbm %s363_s4, 128 }
 0x12b   :  { %p264_p7 = scmp.ne.s32.totalorder %s363_s4, %s263_s21  ;;  %p267_p8 = scmp.lt.u32.totalorder %s263_s21, %s363_s4 }
 0x12d   :  { %p269_p9 = pnand %p267_p8, %p264_p7 }
 0x12f   :  { %272 = shalt.err (!%p269_p9)
}
 0x130   :  { %172 = dma.vmem_to_hbm [thread:$0]  %s170_s3, 128, %s363_s4, [#allocation6]  }
 0x131   :  { %277 = dma.done.wait [#allocation6], 128  }
 0x132   :  { %278 = vsyncadd [#allocation6], 4294967168 }
 0x133   :  { %176 = vsyncpa [#allocation5], 1 }
 0x134   :  { %177 = vsyncpa [#allocation8], 1 }
 0x135   :  { %178 = vsyncpa [#allocation6], 1 }

</bundles_post_ra>
